<compile_context>
chip_gen: v6e
topology: v6e:2x2x1
jax: 0.10.0
libtpu: 0.0.40
codegen_flags: <defaults>
</compile_context>

<pallas_src>
import math
import functools

import jax
import jax.numpy as jnp
from jax.experimental import pallas as pl
from jax.experimental.pallas import tpu as pltpu


# ---------------------------------------------------------------------------
# Helpers
# ---------------------------------------------------------------------------
def _on_tpu():
    try:
        return jax.devices()[0].platform == "tpu"
    except Exception:  # pragma: no cover - defensive
        return False


def _sublane_pack(dtype):
    # Rows per packed vreg sublane group: 8 for 4-byte, 16 for 2-byte, 32 for 1-byte.
    itemsize = max(int(jnp.dtype(dtype).itemsize), 1)
    return max(8, 8 * (4 // itemsize))


def _choose_block_rows(n_rows, row_bytes, pack, target_bytes=4 * 1024 * 1024):
    """Pick block rows: multiple of the sublane pack (or full extent), ~4 MiB/block.

    ~4 MiB of x per block amortizes the ~0.35 us/grid-step overhead to a few
    percent on every generation while keeping total live VMEM (double-buffered
    x + out (+ bits) + pe) well under what we request via vmem_limit_bytes.
    """
    ts = max(1, target_bytes // max(int(row_bytes), 1))
    if ts >= n_rows:
        return n_rows
    ts = (ts // pack) * pack
    if ts < pack:
        ts = pack
    return min(ts, n_rows)


def _vmem_limit_bytes(tiled_block_bytes, pe_block_bytes):
    # Double-buffered tiled operands + double-buffered pe block + headroom.
    need = 2 * (sum(tiled_block_bytes) + pe_block_bytes)
    need = int(need * 1.25) + (2 << 20)
    # Floor at 32 MiB (harmless), cap at 48 MiB (below v7x's 64 MiB physical).
    return int(min(max(need, 32 << 20), 48 << 20))


# ---------------------------------------------------------------------------
# Kernels
# ---------------------------------------------------------------------------
def _pe_add_kernel(x_ref, pe_ref, o_ref, *, batch, d_model):
    # x_ref/o_ref: (TS, B*E); pe_ref: (TS, E).
    # Static per-batch slice adds: no concat temp, direct read->add->store.
    pe_blk = pe_ref[...]
    for b in range(batch):
        sl = slice(b * d_model, (b + 1) * d_model)
        o_ref[:, sl] = x_ref[:, sl] + pe_blk


def _pe_add_dropout_prng_kernel(seed_ref, x_ref, pe_ref, o_ref, *, p, batch, d_model):
    # Training-mode path on real TPU: add PE, then inverted dropout using the
    # hardware PRNG.  RNG stream differs from torch's; semantics (keep prob
    # 1-p, 1/(1-p) rescale) match.
    # Seed mixes the base seed with the block id (variadic seeds are hashed
    # together by the HW PRNG) so blocks get independent masks.
    pltpu.prng_seed(seed_ref[0], pl.program_id(0))

    # Integer-threshold compare: P(bits >= round(p * 2^32)) == 1 - p
    # (off by at most 2^-32; the 2^32-1 clamp is only hit when p rounds to 1).
    threshold = jnp.uint32(min(int(round(p * (2.0 ** 32))), 2 ** 32 - 1))
    scale = jnp.float32(1.0 / (1.0 - p))

    pe_blk = pe_ref[...].astype(jnp.float32)
    for b in range(batch):
        sl = slice(b * d_model, (b + 1) * d_model)
        y = x_ref[:, sl].astype(jnp.float32) + pe_blk
        bits = pltpu.bitcast(pltpu.prng_random_bits(y.shape), jnp.uint32)
        keep = bits >= threshold
        # Select then scale in f32; single cast at the store.
        o_ref[:, sl] = (jnp.where(keep, y, 0.0) * scale).astype(o_ref.dtype)


def _pe_add_dropout_bits_kernel(x_ref, pe_ref, bits_ref, o_ref, *, p, batch, d_model):
    # Fallback training-mode path (non-TPU backends / interpret mode): random
    # uint32 bits are pre-generated outside the kernel and streamed as input.
    threshold = jnp.uint32(min(int(round(p * (2.0 ** 32))), 2 ** 32 - 1))
    scale = jnp.float32(1.0 / (1.0 - p))

    pe_blk = pe_ref[...].astype(jnp.float32)
    for b in range(batch):
        sl = slice(b * d_model, (b + 1) * d_model)
        y = x_ref[:, sl].astype(jnp.float32) + pe_blk
        keep = bits_ref[:, sl] >= threshold
        o_ref[:, sl] = (jnp.where(keep, y, 0.0) * scale).astype(o_ref.dtype)


# ---------------------------------------------------------------------------
# Parameter (buffer) setup — mirrors PyTorch __init__ exactly.
# ---------------------------------------------------------------------------
def make_positional_encoding_table(d_model, max_len=2000, dtype=jnp.float32):
    position = jnp.arange(0, max_len, dtype=jnp.float32)[:, None]        # (L, 1)
    div_term = jnp.exp(
        jnp.arange(0, d_model, 2, dtype=jnp.float32) * (-math.log(10000.0) / d_model)
    )                                                                    # (E/2,)
    pe = jnp.zeros((max_len, d_model), dtype=jnp.float32)
    pe = pe.at[:, 0::2].set(jnp.sin(position * div_term))
    pe = pe.at[:, 1::2].set(jnp.cos(position * div_term))
    # pe.unsqueeze(0).transpose(0, 1) -> (max_len, 1, d_model)
    # Stored directly in the model dtype so the kernel's pe DMA needs no
    # per-call convert pass.
    return pe[:, None, :].astype(dtype)


# ---------------------------------------------------------------------------
# Wrapper
# ---------------------------------------------------------------------------
def positional_encoding_forward(x, pe, *, dropout_p=0.1, training=False, seed=0,
                                block_rows=None):
    """x: (S, B, E); pe: (max_len, 1, E). Returns dropout(x + pe[:S])."""
    S, B, E = x.shape
    C = B * E
    itemsize = jnp.dtype(x.dtype).itemsize

    # Free, contiguous 2-D views: x as (S, B*E), pe slice as (S, E).
    # NOTE: output stores are fully lane-dense (unmasked vst) when C % 128 == 0;
    # any real d_model >= 128 satisfies this.  Other shapes are still correct.
    x2 = x.reshape(S, C)
    pe2 = pe[:S, 0, :]
    if pe2.dtype != x.dtype:
        pe2 = pe2.astype(x.dtype)

    pack = _sublane_pack(x.dtype)
    row_bytes = C * itemsize
    if block_rows is None:
        TS = _choose_block_rows(S, row_bytes, pack)
    else:
        TS = min(int(block_rows), S)
        if TS < S:
            TS = min(max(pack, (TS // pack) * pack), S)
    grid = (pl.cdiv(S, TS),)

    x_block_bytes = TS * row_bytes
    pe_block_bytes = TS * E * itemsize

    if (not training) or dropout_p <= 0.0:
        # Eval mode (or p == 0): nn.Dropout is the identity.
        cparams = pltpu.CompilerParams(
            # "parallel" shards the seq grid across TensorCores on megacore
            # parts (v7x); no-op on single-TC chips.
            dimension_semantics=("parallel",),
            vmem_limit_bytes=_vmem_limit_bytes(
                [x_block_bytes, x_block_bytes], pe_block_bytes),
        )
        out2 = pl.pallas_call(
            functools.partial(_pe_add_kernel, batch=B, d_model=E),
            out_shape=jax.ShapeDtypeStruct((S, C), x.dtype),
            grid=grid,
            in_specs=[
                pl.BlockSpec((TS, C), lambda i: (i, 0)),
                pl.BlockSpec((TS, E), lambda i: (i, 0)),
            ],
            out_specs=pl.BlockSpec((TS, C), lambda i: (i, 0)),
            compiler_params=cparams,
        )(x2, pe2)
        return out2.reshape(S, B, E)

    if dropout_p >= 1.0:
        return jnp.zeros_like(x)

    p = float(dropout_p)

    if _on_tpu():
        # Training mode on real TPU: in-kernel hardware PRNG (no extra HBM
        # traffic for the mask).
        cparams = pltpu.CompilerParams(
            dimension_semantics=("parallel",),
            vmem_limit_bytes=_vmem_limit_bytes(
                [x_block_bytes, x_block_bytes], pe_block_bytes),
        )
        seed_arr = jnp.asarray([seed], dtype=jnp.int32)
        kernel = functools.partial(_pe_add_dropout_prng_kernel, p=p, batch=B, d_model=E)
        out2 = pl.pallas_call(
            kernel,
            out_shape=jax.ShapeDtypeStruct((S, C), x.dtype),
            grid_spec=pltpu.PrefetchScalarGridSpec(
                num_scalar_prefetch=1,
                grid=grid,
                in_specs=[
                    pl.BlockSpec((TS, C), lambda i, seed: (i, 0)),
                    pl.BlockSpec((TS, E), lambda i, seed: (i, 0)),
                ],
                out_specs=pl.BlockSpec((TS, C), lambda i, seed: (i, 0)),
            ),
            compiler_params=cparams,
        )(seed_arr, x2, pe2)
        return out2.reshape(S, B, E)

    # Fallback (non-TPU backend / interpret mode): pltpu.prng_seed has no CPU
    # lowering, so generate the uint32 mask bits outside the kernel and stream
    # them in as a tiled input.
    bits = jax.random.bits(jax.random.PRNGKey(int(seed)), (S, C), dtype=jnp.uint32)
    bits_block_bytes = TS * C * 4
    cparams = pltpu.CompilerParams(
        dimension_semantics=("parallel",),
        vmem_limit_bytes=_vmem_limit_bytes(
            [x_block_bytes, bits_block_bytes, x_block_bytes], pe_block_bytes),
    )
    kernel = functools.partial(_pe_add_dropout_bits_kernel, p=p, batch=B, d_model=E)
    out2 = pl.pallas_call(
        kernel,
        out_shape=jax.ShapeDtypeStruct((S, C), x.dtype),
        grid=grid,
        in_specs=[
            pl.BlockSpec((TS, C), lambda i: (i, 0)),
            pl.BlockSpec((TS, E), lambda i: (i, 0)),
            pl.BlockSpec((TS, C), lambda i: (i, 0)),
        ],
        out_specs=pl.BlockSpec((TS, C), lambda i: (i, 0)),
        compiler_params=cparams,
    )(x2, pe2, bits)
    return out2.reshape(S, B, E)


# ---------------------------------------------------------------------------
# Demo / self-check
# ---------------------------------------------------------------------------
if __name__ == "__main__":
    MAX_LEN = 2000
    key = jax.random.PRNGKey(0)

    # Small shape matching the module convention (seq, batch, d_model); E=128
    # keeps the flattened output lane-dense (C = B*E = 256).
    S, B, E = 8, 2, 128
    x = jax.random.normal(key, (S, B, E), dtype=jnp.float32)
    pe = make_positional_encoding_table(E, max_len=MAX_LEN, dtype=jnp.float32)

    # Eval-mode forward (dropout == identity), same as module.eval() in PyTorch.
    out = positional_encoding_forward(x, pe, dropout_p=0.1, training=False)
    out = jax.block_until_ready(out)
    ref = x + pe[:S]
    assert out.shape == (S, B, E)
    assert jnp.allclose(out, ref, atol=1e-6, rtol=1e-6)

    # Larger sequence to exercise the multi-block grid / pipelined path.
    S2, B2, E2 = 64, 2, 128
    k1, _ = jax.random.split(key)
    x_big = jax.random.normal(k1, (S2, B2, E2), dtype=jnp.float32)
    pe_big = make_positional_encoding_table(E2, max_len=MAX_LEN, dtype=jnp.float32)
    out_big = positional_encoding_forward(x_big, pe_big, dropout_p=0.1,
                                          training=False, block_rows=16)
    out_big = jax.block_until_ready(out_big)
    ref_big = x_big + pe_big[:S2]
    assert jnp.allclose(out_big, ref_big, atol=1e-6, rtol=1e-6)

    # Training path: every output element is either 0 (dropped) or the
    # 1/(1-p)-scaled value of (x + pe); deterministic property, RNG-agnostic.
    # TODO(synk): dropout mask uses a JAX/TPU PRNG stream, not torch's RNG, so
    # it is not bit-identical to PyTorch dropout (stochastic op); semantics match.
    p = 0.1
    out_tr = positional_encoding_forward(x_big, pe_big, dropout_p=p,
                                         training=True, seed=123, block_rows=16)
    out_tr = jax.block_until_ready(out_tr)
    scaled = ref_big * (1.0 / (1.0 - p))
    ok = jnp.logical_or(jnp.isclose(out_tr, 0.0, atol=1e-6),
                        jnp.isclose(out_tr, scaled, atol=1e-4, rtol=1e-4))
    assert out_tr.shape == (S2, B2, E2)
    assert bool(jnp.all(ok))

    print("KERNEL_OK")
</pallas_src>

<mosaic_0001>
module attributes {stable_mosaic.version = 11 : i64} {
  func.func @_pe_add_kernel(%arg0: i32, %arg1: memref<8x256xf32, #tpu.memory_space<vmem>>, %arg2: memref<8x128xf32, #tpu.memory_space<vmem>>, %arg3: memref<8x256xf32, #tpu.memory_space<vmem>>) attributes {dimension_semantics = [#tpu.dimension_semantics<parallel>], iteration_bounds = array<i64: 1>, scalar_prefetch = 0 : i64, scratch_operands = 0 : i64, tpu.core_type = #tpu.core_type<tc>, window_params = [{transform_indices = @transform_0, window_bounds = array<i64: 8, 256>}, {transform_indices = @transform_1, window_bounds = array<i64: 8, 128>}, {transform_indices = @transform_2, window_bounds = array<i64: 8, 256>}]} {
    %c0 = arith.constant 0 : index
    %c0_0 = arith.constant 0 : index
    %0 = vector.load %arg2[%c0, %c0_0] : memref<8x128xf32, #tpu.memory_space<vmem>>, vector<8x128xf32>
    %c0_1 = arith.constant 0 : index
    %c0_2 = arith.constant 0 : index
    %1 = vector.load %arg1[%c0_1, %c0_2] : memref<8x256xf32, #tpu.memory_space<vmem>>, vector<8x128xf32>
    %2 = arith.addf %1, %0 : vector<8x128xf32>
    %c0_3 = arith.constant 0 : index
    %c0_4 = arith.constant 0 : index
    %3 = vector.load %arg3[%c0_3, %c0_4] : memref<8x256xf32, #tpu.memory_space<vmem>>, vector<8x128xf32>
    tpu.vector_store %arg3[%c0_3, %c0_4], %2 {strides = array<i32>} : memref<8x256xf32, #tpu.memory_space<vmem>>, vector<8x128xf32>,
    %c0_5 = arith.constant 0 : index
    %c128 = arith.constant 128 : index
    %4 = vector.load %arg1[%c0_5, %c128] : memref<8x256xf32, #tpu.memory_space<vmem>>, vector<8x128xf32>
    %5 = arith.addf %4, %0 : vector<8x128xf32>
    %c0_6 = arith.constant 0 : index
    %c128_7 = arith.constant 128 : index
    %6 = vector.load %arg3[%c0_6, %c128_7] : memref<8x256xf32, #tpu.memory_space<vmem>>, vector<8x128xf32>
    tpu.vector_store %arg3[%c0_6, %c128_7], %5 {strides = array<i32>} : memref<8x256xf32, #tpu.memory_space<vmem>>, vector<8x128xf32>,
    return
  }
  func.func @transform_0(%arg0: i32) -> (i32, i32) {
    %c0_i32 = arith.constant 0 : i32
    %c0_i32_0 = arith.constant 0 : i32
    return %arg0, %c0_i32 : i32, i32
  }
  func.func @transform_1(%arg0: i32) -> (i32, i32) {
    %c0_i32 = arith.constant 0 : i32
    %c0_i32_0 = arith.constant 0 : i32
    return %arg0, %c0_i32 : i32, i32
  }
  func.func @transform_2(%arg0: i32) -> (i32, i32) {
    %c0_i32 = arith.constant 0 : i32
    %c0_i32_0 = arith.constant 0 : i32
    return %arg0, %c0_i32 : i32, i32
  }
}

</mosaic_0001>

<bundles_post_ra>
// kernel: tpu_custom_call.1
= control target key start
LH: loop header
LB: loop body
LE: loop exit
PB: predicated region body
PF: predicated region fallthrough
CT: control target
= control target key end

     0   :  { %7 = vsyncpa [#allocation3], 0  ;;  %s155_s0 = inlined_call_operand.hbm [shape: f32[8,256], index: 0, kind: input, shape index: {}]   ;;  %s156_s1 = inlined_call_operand.hbm [shape: f32[8,128], index: 1, kind: input, shape index: {}]   ;;  %s157_s2 = inlined_call_operand.hbm [shape: f32[8,256], index: 2, kind: output, shape index: {}]  }
   0x1   :  { %8 = vsyncpa [#allocation6], 0 }
   0x2   :  { %9 = vsyncpa [#allocation4], 0  ;;  %s128_s9 = smov [#allocation2]   ;;  %s129_s11 = smov [#allocation5]  }
   0x3   :  { %s16_s10 = sshll.u32 %s128_s9, 4  ;;  %s26_s12 = sshll.u32 %s129_s11, 4  ;;  %s17_s10 = int_to_ptr.vmem [resolvable:$true] %s16_s10  ;;  %s27_s12 = int_to_ptr.vmem [resolvable:$true] %s26_s12 }
   0x4   :  { %s70_s13 = scalar_lea.vmem %s17_s10, 256  ;;  %p75_p1 = scmp.lt.s32.totalorder %s17_s10, %s17_s10 }
   0x5   :  { %p71_p0 = scmp.ne.s32.totalorder %s17_s10, %s70_s13  ;;  %p76_p2 = scmp.lt.s32.totalorder %s70_s13, %s70_s13 }
   0x7   :  { %p77_p3 = por %p76_p2, %p75_p1 }
   0x9   :  { %p78_p4 = pnand %p77_p3, %p71_p0 }
   0xb   :  { %81 = shalt.err (!%p78_p4)
}
   0xc   :  { %19 = dma.hbm_to_vmem [thread:$0]  %s155_s0, 256, %s17_s10, [#allocation3]  }
   0xd   :  { %s90_s16 = scalar_lea.vmem %s27_s12, 128  ;;  %p95_p6 = scmp.lt.s32.totalorder %s27_s12, %s27_s12 }
   0xe   :  { %p91_p5 = scmp.ne.s32.totalorder %s27_s12, %s90_s16  ;;  %p96_p7 = scmp.lt.s32.totalorder %s90_s16, %s90_s16 }
  0x10   :  { %p97_p8 = por %p96_p7, %p95_p6 }
  0x12   :  { %p98_p9 = pnand %p97_p8, %p91_p5 }
  0x14   :  { %101 = shalt.err (!%p98_p9)
}
  0x15   :  { %29 = dma.hbm_to_vmem [thread:$0]  %s156_s1, 128, %s27_s12, [#allocation6]  }
  0x16   :  { %122 = dma.done.wait [#allocation3], 256  }
  0x17   :  { %123 = vsyncadd [#allocation3], 4294967040 }
  0x18   :  { %124 = dma.done.wait [#allocation6], 128  }
  0x19   :  { %125 = vsyncadd [#allocation6], 4294967168  ;;  %s130_s19 = smov [#allocation7]   ;;  %v36_v0 = vld [vmem:[#allocation5] sm:$0xff]  ;;  %v37_v1 = vld [vmem:[#allocation2] sm:$0xff] }
  0x1a   :  { %s49_s20 = sshll.u32 %s130_s19, 4  ;;  %v40_v2 = vld [vmem:[#allocation2 + $0x8] sm:$0xff]  ;;  %v38_v3 = vadd.f32 %v37_v1, %v36_v0  ;;  %s50_s20 = int_to_ptr.vmem [resolvable:$true] %s49_s20 }
  0x1b   :  { %v41_v4 = vadd.f32 %v40_v2, %v36_v0  ;;  %s102_s0 = scalar_lea.vmem %s50_s20, 256  ;;  %p107_p11 = scmp.lt.s32.totalorder %s50_s20, %s50_s20 }
  0x1c   :  { %39 = vst [vmem:[#allocation7] sm:$0xff] %v38_v3  ;;  %p103_p10 = scmp.ne.s32.totalorder %s50_s20, %s102_s0  ;;  %p108_p12 = scmp.lt.s32.totalorder %s102_s0, %s102_s0 }
  0x1d   :  { %42 = vst [vmem:[#allocation7 + $0x8] sm:$0xff] %v41_v4 }
  0x1e   :  { %p109_p13 = por %p108_p12, %p107_p11 }
  0x20   :  { %p110_p0 = pnand %p109_p13, %p103_p10 }
  0x22   :  { %113 = shalt.err (!%p110_p0)
}
  0x23   :  { %52 = dma.vmem_to_hbm [thread:$0]  %s50_s20, 256, %s157_s2, [#allocation4]  }
  0x24   :  { %126 = dma.done.wait [#allocation4], 256  }
  0x25   :  { %127 = vsyncadd [#allocation4], 4294967040 }
  0x26   :  { %56 = vsyncpa [#allocation3], 1 }
  0x27   :  { %57 = vsyncpa [#allocation6], 1 }
  0x28   :  { %58 = vsyncpa [#allocation4], 1 }

</bundles_post_ra>
